<compile_context>
chip_gen: v7x
topology: tpu7x:2x2x1
jax: 0.10.0
libtpu: 0.0.40
codegen_flags: <defaults>
</compile_context>

<pallas_src>
import jax
import jax.numpy as jnp
from jax.experimental import pallas as pl
from jax.experimental.pallas import tpu as pltpu

IN_FEATURES = 1 * 54 * 46   # 2484
K_PAD = 2560                # next multiple of 128 >= 2484
HIDDEN = 256
OUT = 1


def _round_up(x, m):
    return ((x + m - 1) // m) * m


def f_network_kernel(x_ref, w1_ref, b1_ref, w2_ref, b2_ref, out_ref):
    # x_ref:  (TM, K_PAD)     bf16   (streamed per batch tile)
    # w1_ref: (K_PAD, HIDDEN) bf16   (VMEM-resident)
    # b1_ref: (1, HIDDEN)     f32    (VMEM-resident)
    # w2_ref: (1, HIDDEN)     f32    (VMEM-resident, second-layer weight as a row)
    # b2_ref: (1, 1)          f32    (VMEM-resident)
    # out_ref:(TM, 1)         f32
    h = jnp.dot(x_ref[...], w1_ref[...],
                preferred_element_type=jnp.float32)            # (TM, 256) f32 acc
    h = h + b1_ref[...]                                        # f32 bias add (VPU)
    # Layer 2 as VPU mul + XLU lane reduce; MXU stays free for the next tile.
    y = jnp.sum(h * w2_ref[...], axis=-1, keepdims=True)       # (TM, 1)
    out_ref[...] = y + b2_ref[...]


def f_network_forward(global_state, w1, b1, w2, b2, *, tm=None):
    """global_state: (B, 1, 54, 46) float32 (NCHW). Returns (B, 1) float32.

    w1: (2484, 256), b1: (1, 256), w2: (256, 1), b2: (1, 1)  (weights stored
    transposed vs. torch so the kernel computes y = x @ W + b directly).
    """
    B = global_state.shape[0]

    # Batch tile: large enough to fill the MXU M dim for big batches, otherwise
    # the whole (sublane-padded) batch in one tile.
    if tm is None:
        tm = 512 if B >= 512 else max(8, _round_up(B, 8))
    b_pad = _round_up(B, tm)

    # Flatten exactly like torch.flatten(start_dim=1), cast to bf16, zero-pad
    # K 2484 -> 2560 and batch B -> b_pad in a single fused pad.
    x = global_state.reshape(B, -1).astype(jnp.bfloat16)
    x = jnp.pad(x, ((0, b_pad - B), (0, K_PAD - IN_FEATURES)))

    w1_p = jnp.pad(w1.astype(jnp.bfloat16), ((0, K_PAD - IN_FEATURES), (0, 0)))
    b1_f32 = b1.reshape(1, HIDDEN).astype(jnp.float32)
    w2_row = w2.astype(jnp.float32).reshape(HIDDEN, OUT).T     # (1, 256)
    b2_f32 = b2.reshape(1, OUT).astype(jnp.float32)

    grid = (b_pad // tm,)

    cost = pl.CostEstimate(
        flops=2 * b_pad * K_PAD * HIDDEN + 2 * b_pad * HIDDEN,
        transcendentals=0,
        bytes_accessed=(x.size * 2) + (w1_p.size * 2)
        + (HIDDEN * 4 * 2) + 4 + (b_pad * OUT * 4),
    )

    out = pl.pallas_call(
        f_network_kernel,
        out_shape=jax.ShapeDtypeStruct((b_pad, OUT), jnp.float32),
        grid_spec=pltpu.PrefetchScalarGridSpec(
            num_scalar_prefetch=0,
            grid=grid,
            in_specs=[
                pl.BlockSpec((tm, K_PAD), lambda i: (i, 0)),       # x tile (streamed)
                pl.BlockSpec((K_PAD, HIDDEN), lambda i: (0, 0)),   # w1 (resident)
                pl.BlockSpec((1, HIDDEN), lambda i: (0, 0)),       # b1 (resident)
                pl.BlockSpec((1, HIDDEN), lambda i: (0, 0)),       # w2 row (resident)
                pl.BlockSpec((1, OUT), lambda i: (0, 0)),          # b2 (resident)
            ],
            out_specs=pl.BlockSpec((tm, OUT), lambda i: (i, 0)),
        ),
        compiler_params=pltpu.CompilerParams(
            dimension_semantics=("parallel",),
        ),
        cost_estimate=cost,
    )(x, w1_p, b1_f32, w2_row, b2_f32)

    return out[:B]


def init_params(key):
    # Deterministic synthetic init mirroring nn.Linear's uniform(-1/sqrt(fan_in), ...)
    k1, k2, k3, k4 = jax.random.split(key, 4)
    bound1 = 1.0 / jnp.sqrt(jnp.float32(IN_FEATURES))
    bound2 = 1.0 / jnp.sqrt(jnp.float32(HIDDEN))
    w1 = jax.random.uniform(k1, (IN_FEATURES, HIDDEN), jnp.float32, -bound1, bound1)
    b1 = jax.random.uniform(k2, (1, HIDDEN), jnp.float32, -bound1, bound1)
    w2 = jax.random.uniform(k3, (HIDDEN, OUT), jnp.float32, -bound2, bound2)
    b2 = jax.random.uniform(k4, (1, OUT), jnp.float32, -bound2, bound2)
    return w1, b1, w2, b2


if __name__ == "__main__":
    key = jax.random.PRNGKey(0)
    pkey, xkey = jax.random.split(key)
    w1, b1, w2, b2 = init_params(pkey)

    B = 2
    global_state = jax.random.normal(xkey, (B, 1, 54, 46), dtype=jnp.float32)

    out = f_network_forward(global_state, w1, b1, w2, b2)
    out = jax.block_until_ready(out)

    # Pure-JAX f32 reference (original module semantics). The kernel uses bf16
    # inputs with f32 accumulation, so allow a modest tolerance.
    ref = global_state.reshape(B, -1) @ w1 + b1
    ref = ref @ w2 + b2
    assert out.shape == (B, 1), out.shape
    assert jnp.allclose(out, ref, atol=5e-2, rtol=5e-2), (out, ref)

    print("KERNEL_OK")
</pallas_src>

<mosaic_0001>
module attributes {stable_mosaic.version = 11 : i64} {
  func.func @f_network_kernel(%arg0: i32, %arg1: memref<8x2560xbf16, #tpu.memory_space<vmem>>, %arg2: memref<2560x256xbf16, #tpu.memory_space<vmem>>, %arg3: memref<1x256xf32, #tpu.memory_space<vmem>>, %arg4: memref<1x256xf32, #tpu.memory_space<vmem>>, %arg5: memref<1x1xf32, #tpu.memory_space<vmem>>, %arg6: memref<8x1xf32, #tpu.memory_space<vmem>>) attributes {dimension_semantics = [#tpu.dimension_semantics<parallel>], iteration_bounds = array<i64: 1>, scalar_prefetch = 0 : i64, scratch_operands = 0 : i64, tpu.core_type = #tpu.core_type<tc>, window_params = [{transform_indices = @transform_0, window_bounds = array<i64: 8, 2560>}, {pipeline_mode = #tpu.pipeline_mode<synchronous>, transform_indices = @transform_1, window_bounds = array<i64: 2560, 256>}, {pipeline_mode = #tpu.pipeline_mode<synchronous>, transform_indices = @transform_2, window_bounds = array<i64: 1, 256>}, {pipeline_mode = #tpu.pipeline_mode<synchronous>, transform_indices = @transform_3, window_bounds = array<i64: 1, 256>}, {pipeline_mode = #tpu.pipeline_mode<synchronous>, transform_indices = @transform_4, window_bounds = array<i64: 1, 1>}, {transform_indices = @transform_5, window_bounds = array<i64: 8, 1>}]} {
    %c0 = arith.constant 0 : index
    %c0_0 = arith.constant 0 : index
    %0 = vector.load %arg1[%c0, %c0_0] : memref<8x2560xbf16, #tpu.memory_space<vmem>>, vector<8x2560xbf16>
    %c0_1 = arith.constant 0 : index
    %c0_2 = arith.constant 0 : index
    %1 = vector.load %arg2[%c0_1, %c0_2] : memref<2560x256xbf16, #tpu.memory_space<vmem>>, vector<2560x256xbf16>
    %cst = arith.constant dense<0.000000e+00> : vector<8x256xf32>
    %2 = tpu.matmul %0, %1, %cst {dimension_numbers = #tpu.dot_dimension_numbers<[1], [0], [0], [1], [0, 0, 1, 1], [], []>} : vector<8x2560xbf16>, vector<2560x256xbf16>, vector<8x256xf32> -> vector<8x256xf32>
    %c0_3 = arith.constant 0 : index
    %c0_4 = arith.constant 0 : index
    %3 = vector.load %arg3[%c0_3, %c0_4] : memref<1x256xf32, #tpu.memory_space<vmem>>, vector<1x256xf32>
    %4 = vector.broadcast %3 : vector<1x256xf32> to vector<8x256xf32>
    %5 = arith.addf %2, %4 : vector<8x256xf32>
    %c0_5 = arith.constant 0 : index
    %c0_6 = arith.constant 0 : index
    %6 = vector.load %arg4[%c0_5, %c0_6] : memref<1x256xf32, #tpu.memory_space<vmem>>, vector<1x256xf32>
    %7 = vector.broadcast %6 : vector<1x256xf32> to vector<8x256xf32>
    %8 = arith.mulf %5, %7 : vector<8x256xf32>
    %cst_7 = arith.constant dense<0.000000e+00> : vector<8xf32>
    %9 = vector.multi_reduction <add>, %8, %cst_7 [1] : vector<8x256xf32> to vector<8xf32>
    %10 = vector.shape_cast %9 : vector<8xf32> to vector<8x1xf32>
    %c0_8 = arith.constant 0 : index
    %c0_9 = arith.constant 0 : index
    %11 = vector.load %arg5[%c0_8, %c0_9] : memref<1x1xf32, #tpu.memory_space<vmem>>, vector<1x1xf32>
    %12 = vector.broadcast %11 : vector<1x1xf32> to vector<8x1xf32>
    %13 = arith.addf %10, %12 : vector<8x1xf32>
    %c0_10 = arith.constant 0 : index
    %c0_11 = arith.constant 0 : index
    %14 = vector.load %arg6[%c0_10, %c0_11] : memref<8x1xf32, #tpu.memory_space<vmem>>, vector<8x1xf32>
    tpu.vector_store %arg6[%c0_10, %c0_11], %13 {strides = array<i32>} : memref<8x1xf32, #tpu.memory_space<vmem>>, vector<8x1xf32>,
    return
  }
  func.func @transform_0(%arg0: i32) -> (i32, i32) {
    %c0_i32 = arith.constant 0 : i32
    %c0_i32_0 = arith.constant 0 : i32
    return %arg0, %c0_i32 : i32, i32
  }
  func.func @transform_1(%arg0: i32) -> (i32, i32) {
    %c0_i32 = arith.constant 0 : i32
    %c0_i32_0 = arith.constant 0 : i32
    %c0_i32_1 = arith.constant 0 : i32
    return %c0_i32, %c0_i32_0 : i32, i32
  }
  func.func @transform_2(%arg0: i32) -> (i32, i32) {
    %c0_i32 = arith.constant 0 : i32
    %c0_i32_0 = arith.constant 0 : i32
    %c0_i32_1 = arith.constant 0 : i32
    return %c0_i32, %c0_i32_0 : i32, i32
  }
  func.func @transform_3(%arg0: i32) -> (i32, i32) {
    %c0_i32 = arith.constant 0 : i32
    %c0_i32_0 = arith.constant 0 : i32
    %c0_i32_1 = arith.constant 0 : i32
    return %c0_i32, %c0_i32_0 : i32, i32
  }
  func.func @transform_4(%arg0: i32) -> (i32, i32) {
    %c0_i32 = arith.constant 0 : i32
    %c0_i32_0 = arith.constant 0 : i32
    %c0_i32_1 = arith.constant 0 : i32
    return %c0_i32, %c0_i32_0 : i32, i32
  }
  func.func @transform_5(%arg0: i32) -> (i32, i32) {
    %c0_i32 = arith.constant 0 : i32
    %c0_i32_0 = arith.constant 0 : i32
    return %arg0, %c0_i32 : i32, i32
  }
}

</mosaic_0001>

<bundles_post_ra>
// kernel: tpu_custom_call.1
= control target key start
LH: loop header
LB: loop body
LE: loop exit
PB: predicated region body
PF: predicated region fallthrough
CT: control target
= control target key end

     0   :  { %s3642_s0 = inlined_call_operand.hbm [shape: bf16[8,2560], index: 0, kind: input, shape index: {}]   ;;  %s3643_s1 = inlined_call_operand.hbm [shape: bf16[2560,256], index: 1, kind: input, shape index: {}]   ;;  %s3644_s2 = inlined_call_operand.hbm [shape: f32[1,256], index: 2, kind: input, shape index: {}]   ;;  %s3645_s3 = inlined_call_operand.hbm [shape: f32[1,256], index: 3, kind: input, shape index: {}]   ;;  %s3646_s4 = inlined_call_operand.<no memory space> [shape: f32[1,1], index: 4, kind: input, shape index: {}]   ;;  %s3647_s5 = inlined_call_operand.vmem [shape: f32[8,1], index: 5, kind: output, shape index: {}]  }
   0x1   :  { %v10_v0 = vstv %s3646_s4 }
   0x2   :  { %11 = vst [vmem:[#allocation2] sm:$0x1] %v10_v0 }
   0x3   :  { %12 = vsyncpa [#allocation4], 0 }
   0x4   :  { %13 = vsyncpa [#allocation6], 0 }
   0x5   :  { %14 = vsyncpa [#allocation9], 0  ;;  %s3504_s20 = smov [#allocation5]   ;;  %s3410_s24 = scalar_lea.hbm %s3643_s1, 40960 }
   0x6   :  { %s30_s21 = sshll.u32 %s3504_s20, 4  ;;  %p3411_p0 = scmp.ne.s32.totalorder %s3643_s1, %s3410_s24  ;;  %s31_s21 = int_to_ptr.vmem [resolvable:$true] %s30_s21 }
   0x7   :  { %p3414_p1 = scmp.lt.u32.totalorder %s3410_s24, %s3643_s1 }
   0x9   :  { %p3416_p2 = pnand %p3414_p1, %p3411_p0 }
   0xb   :  { %3419 = shalt.err (!%p3416_p2)
}
   0xc   :  { %s3420_s4 = scalar_lea.vmem %s31_s21, 40960  ;;  %p3425_p4 = scmp.lt.s32.totalorder %s31_s21, %s31_s21 }
   0xd   :  { %p3421_p3 = scmp.ne.s32.totalorder %s31_s21, %s3420_s4  ;;  %p3426_p5 = scmp.lt.s32.totalorder %s3420_s4, %s3420_s4 }
   0xf   :  { %p3427_p6 = por %p3426_p5, %p3425_p4 }
  0x11   :  { %p3428_p7 = pnand %p3427_p6, %p3421_p3 }
  0x13   :  { %3431 = shalt.err (!%p3428_p7)
}
  0x14   :  { %s3505_s29 = smov 128   ;;  %s3506_s30 = smov 8  }
  0x15   :  { %36 = dma.hbm_to_vmem [thread:$0]  %s3643_s1, 40960, %s31_s21, [#allocation6], %s3505_s29, %s3505_s29, %s3506_s30  }
  0x16   :  { %s3507_s8 = smov [#allocation3]   ;;  %s3508_s10 = smov [#allocation7]  }
  0x17   :  { %s21_s9 = sshll.u32 %s3507_s8, 4  ;;  %s43_s11 = sshll.u32 %s3508_s10, 4  ;;  %s22_s9 = int_to_ptr.vmem [resolvable:$true] %s21_s9  ;;  %s44_s11 = int_to_ptr.vmem [resolvable:$true] %s43_s11 }
  0x18   :  { %s3432_s14 = scalar_lea.hbm %s3642_s0, 1280 }
  0x19   :  { %p3433_p8 = scmp.ne.s32.totalorder %s3642_s0, %s3432_s14  ;;  %p3436_p9 = scmp.lt.u32.totalorder %s3432_s14, %s3642_s0 }
  0x1b   :  { %p3438_p10 = pnand %p3436_p9, %p3433_p8 }
  0x1d   :  { %3441 = shalt.err (!%p3438_p10)
}
  0x1e   :  { %s3442_s1 = scalar_lea.vmem %s22_s9, 1280  ;;  %p3447_p12 = scmp.lt.s32.totalorder %s22_s9, %s22_s9 }
  0x1f   :  { %p3443_p11 = scmp.ne.s32.totalorder %s22_s9, %s3442_s1  ;;  %p3448_p13 = scmp.lt.s32.totalorder %s3442_s1, %s3442_s1 }
  0x21   :  { %p3449_p0 = por %p3448_p13, %p3447_p12 }
  0x23   :  { %p3450_p1 = pnand %p3449_p0, %p3443_p11 }
  0x25   :  { %3453 = shalt.err (!%p3450_p1)
}
  0x26   :  { %24 = dma.hbm_to_vmem [thread:$0]  %s3642_s0, 1280, %s22_s9, [#allocation4]  }
  0x27   :  { %s3454_s23 = scalar_lea.hbm %s3644_s2, 32 }
  0x28   :  { %p3455_p2 = scmp.ne.s32.totalorder %s3644_s2, %s3454_s23  ;;  %p3458_p3 = scmp.lt.u32.totalorder %s3454_s23, %s3644_s2 }
  0x2a   :  { %p3460_p4 = pnand %p3458_p3, %p3455_p2 }
  0x2c   :  { %3463 = shalt.err (!%p3460_p4)
}
  0x2d   :  { %s3464_s28 = scalar_lea.vmem %s44_s11, 32  ;;  %p3469_p6 = scmp.lt.s32.totalorder %s44_s11, %s44_s11 }
  0x2e   :  { %p3465_p5 = scmp.ne.s32.totalorder %s44_s11, %s3464_s28  ;;  %p3470_p7 = scmp.lt.s32.totalorder %s3464_s28, %s3464_s28 }
  0x30   :  { %p3471_p8 = por %p3470_p7, %p3469_p6 }
  0x32   :  { %p3472_p9 = pnand %p3471_p8, %p3465_p5 }
  0x34   :  { %3475 = shalt.err (!%p3472_p9)
}
  0x35   :  { %46 = dma.hbm_to_vmem [thread:$0]  %s3644_s2, 32, %s44_s11, [#allocation6]  }
  0x36   :  { %s3509_s29 = smov [#allocation8]   ;;  %s3476_s8 = scalar_lea.hbm %s3645_s3, 32 }
  0x37   :  { %s53_s30 = sshll.u32 %s3509_s29, 4  ;;  %p3477_p10 = scmp.ne.s32.totalorder %s3645_s3, %s3476_s8  ;;  %s54_s30 = int_to_ptr.vmem [resolvable:$true] %s53_s30 }
  0x38   :  { %p3480_p11 = scmp.lt.u32.totalorder %s3476_s8, %s3645_s3 }
  0x3a   :  { %p3482_p12 = pnand %p3480_p11, %p3477_p10 }
  0x3c   :  { %3485 = shalt.err (!%p3482_p12)
}
  0x3d   :  { %s3486_s14 = scalar_lea.vmem %s54_s30, 32  ;;  %p3491_p0 = scmp.lt.s32.totalorder %s54_s30, %s54_s30 }
  0x3e   :  { %p3487_p13 = scmp.ne.s32.totalorder %s54_s30, %s3486_s14  ;;  %p3492_p1 = scmp.lt.s32.totalorder %s3486_s14, %s3486_s14 }
  0x40   :  { %p3493_p2 = por %p3492_p1, %p3491_p0 }
  0x42   :  { %p3494_p3 = pnand %p3493_p2, %p3487_p13 }
  0x44   :  { %3497 = shalt.err (!%p3494_p3)
}
  0x45   :  { %56 = dma.hbm_to_vmem [thread:$0]  %s3645_s3, 32, %s54_s30, [#allocation9]  }
  0x46   :  { %3498 = dma.done.wait [#allocation4], 1280  }
  0x47   :  { %3499 = vsyncadd [#allocation4], 4294966016 }
  0x48   :  { %3500 = dma.done.wait [#allocation6], 40992  }
  0x49   :  { %3501 = vsyncadd [#allocation6], 4294926304 }
  0x4a   :  { %3502 = dma.done.wait [#allocation9], 32  }
  0x4b   :  { %3503 = vsyncadd [#allocation9], 4294967264  ;;  %v2910_v1 = vld [vmem:[#allocation5 + $0x4] ss:$8 sps:$4 sm:$0xff]   ;;  %v2914_v3 = vld [vmem:[#allocation5] ss:$8 sps:$4 sm:$0xff]  }
  0x4c   :  { %v2912_v2 = vld [vmem:[#allocation5 + $0x504] ss:$8 sps:$4 sm:$0xff]   ;;  %2083 = vmatprep.subr.bf16.mxu1 %v2910_v1  ;;  %v2915_v4 = vld [vmem:[#allocation5 + $0x500] ss:$8 sps:$4 sm:$0xff]   ;;  %v2916_v5 = vld [vmem:[#allocation5 + $0x14] ss:$8 sps:$4 sm:$0xff]  }
  0x4d   :  { %2288 = vmatprep.subr.bf16.mxu0 %v2912_v2  ;;  %2084 = vmatpush1.bf16.msra.mxu1 %v2914_v3  ;;  %v2918_v6 = vld [vmem:[#allocation5 + $0x514] ss:$8 sps:$4 sm:$0xff]   ;;  %v2920_v7 = vld [vmem:[#allocation5 + $0x10] ss:$8 sps:$4 sm:$0xff]   ;;  %v2922_v9 = vld [vmem:[#allocation5 + $0x24] ss:$8 sps:$4 sm:$0xff]  }
  0x4e   :  { %2289 = vmatpush1.bf16.msra.mxu0 %v2915_v4  ;;  %2085 = vmatprep.subr.bf16.mxu1 %v2916_v5  ;;  %v2921_v8 = vld [vmem:[#allocation5 + $0x510] ss:$8 sps:$4 sm:$0xff]   ;;  %v2924_v10 = vld [vmem:[#allocation5 + $0x524] ss:$8 sps:$4 sm:$0xff]   ;;  %v2926_v11 = vld [vmem:[#allocation5 + $0x20] ss:$8 sps:$4 sm:$0xff]  }
  0x4f   :  { %2290 = vmatprep.subr.bf16.mxu0 %v2918_v6  ;;  %v2927_v12 = vld [vmem:[#allocation5 + $0x520] ss:$8 sps:$4 sm:$0xff]   ;;  %v2928_v13 = vld [vmem:[#allocation5 + $0x34] ss:$8 sps:$4 sm:$0xff]   ;;  %v2932_v15 = vld [vmem:[#allocation5 + $0x30] ss:$8 sps:$4 sm:$0xff]  }
  0x50   :  { %v2930_v14 = vld [vmem:[#allocation5 + $0x534] ss:$8 sps:$4 sm:$0xff]   ;;  %v2933_v16 = vld [vmem:[#allocation5 + $0x530] ss:$8 sps:$4 sm:$0xff]   ;;  %v2934_v17 = vld [vmem:[#allocation5 + $0x44] ss:$8 sps:$4 sm:$0xff]  }
  0x51   :  { %2086 = vmatpush1.bf16.msra.mxu1 %v2920_v7  ;;  %v2936_v18 = vld [vmem:[#allocation5 + $0x544] ss:$8 sps:$4 sm:$0xff]   ;;  %v2938_v19 = vld [vmem:[#allocation5 + $0x40] ss:$8 sps:$4 sm:$0xff]   ;;  %v2940_v21 = vld [vmem:[#allocation5 + $0x54] ss:$8 sps:$4 sm:$0xff]  }
  0x52   :  { %2291 = vmatpush1.bf16.msra.mxu0 %v2921_v8  ;;  %2087 = vmatprep.subr.bf16.mxu1 %v2922_v9  ;;  %v2939_v20 = vld [vmem:[#allocation5 + $0x540] ss:$8 sps:$4 sm:$0xff]   ;;  %v2942_v22 = vld [vmem:[#allocation5 + $0x554] ss:$8 sps:$4 sm:$0xff]   ;;  %v2944_v23 = vld [vmem:[#allocation5 + $0x50] ss:$8 sps:$4 sm:$0xff]  }
  0x53   :  { %2292 = vmatprep.subr.bf16.mxu0 %v2924_v10  ;;  %v2945_v24 = vld [vmem:[#allocation5 + $0x550] ss:$8 sps:$4 sm:$0xff]   ;;  %v2946_v25 = vld [vmem:[#allocation5 + $0x64] ss:$8 sps:$4 sm:$0xff]   ;;  %v2950_v27 = vld [vmem:[#allocation5 + $0x60] ss:$8 sps:$4 sm:$0xff]  }
  0x54   :  { %v2948_v26 = vld [vmem:[#allocation5 + $0x564] ss:$8 sps:$4 sm:$0xff]   ;;  %v2951_v28 = vld [vmem:[#allocation5 + $0x560] ss:$8 sps:$4 sm:$0xff]   ;;  %v2952_v29 = vld [vmem:[#allocation5 + $0x74] ss:$8 sps:$4 sm:$0xff]  }
  0x55   :  { %2088 = vmatpush1.bf16.msra.mxu1 %v2926_v11  ;;  %v2954_v30 = vld [vmem:[#allocation5 + $0x574] ss:$8 sps:$4 sm:$0xff]   ;;  %v2956_v31 = vld [vmem:[#allocation5 + $0x70] ss:$8 sps:$4 sm:$0xff]   ;;  %v2958_v33 = vld [vmem:[#allocation5 + $0x84] ss:$8 sps:$4 sm:$0xff]  }
  0x56   :  { %2293 = vmatpush1.bf16.msra.mxu0 %v2927_v12  ;;  %2089 = vmatprep.subr.bf16.mxu1 %v2928_v13  ;;  %v2957_v32 = vld [vmem:[#allocation5 + $0x570] ss:$8 sps:$4 sm:$0xff]   ;;  %v2960_v34 = vld [vmem:[#allocation5 + $0x584] ss:$8 sps:$4 sm:$0xff]   ;;  %v2962_v35 = vld [vmem:[#allocation5 + $0x80] ss:$8 sps:$4 sm:$0xff]  }
  0x57   :  { %2294 = vmatprep.subr.bf16.mxu0 %v2930_v14  ;;  %v2963_v36 = vld [vmem:[#allocation5 + $0x580] ss:$8 sps:$4 sm:$0xff]   ;;  %v2964_v37 = vld [vmem:[#allocation5 + $0x94] ss:$8 sps:$4 sm:$0xff]   ;;  %v2968_v39 = vld [vmem:[#allocation5 + $0x90] ss:$8 sps:$4 sm:$0xff]  }
  0x58   :  { %v2966_v38 = vld [vmem:[#allocation5 + $0x594] ss:$8 sps:$4 sm:$0xff]   ;;  %v2969_v40 = vld [vmem:[#allocation5 + $0x590] ss:$8 sps:$4 sm:$0xff]   ;;  %v2970_v41 = vld [vmem:[#allocation5 + $0xa4] ss:$8 sps:$4 sm:$0xff]  }
  0x59   :  { %2090 = vmatpush1.bf16.msra.mxu1 %v2932_v15  ;;  %v2972_v42 = vld [vmem:[#allocation5 + $0x5a4] ss:$8 sps:$4 sm:$0xff]   ;;  %v2974_v43 = vld [vmem:[#allocation5 + $0xa0] ss:$8 sps:$4 sm:$0xff]   ;;  %v2976_v45 = vld [vmem:[#allocation5 + $0xb4] ss:$8 sps:$4 sm:$0xff]  }
  0x5a   :  { %2295 = vmatpush1.bf16.msra.mxu0 %v2933_v16  ;;  %2091 = vmatprep.subr.bf16.mxu1 %v2934_v17  ;;  %v2975_v44 = vld [vmem:[#allocation5 + $0x5a0] ss:$8 sps:$4 sm:$0xff]   ;;  %v2978_v46 = vld [vmem:[#allocation5 + $0x5b4] ss:$8 sps:$4 sm:$0xff]   ;;  %v2980_v48 = vld [vmem:[#allocation5 + $0xb0] ss:$8 sps:$4 sm:$0xff]  }
  0x5b   :  { %2296 = vmatprep.subr.bf16.mxu0 %v2936_v18  ;;  %v71_v47 = vld [vmem:[#allocation3] sm:$0xff]  ;;  %v76_v51 = vld [vmem:[#allocation3 + $0x28] sm:$0xff]  ;;  %v2982_v52 = vld [vmem:[#allocation5 + $0xc4] ss:$8 sps:$4 sm:$0xff]   ;;  %vm2518_vm0 = vcmask 7168  }
  0x5c   :  { %v2528_v49 = vcombine.high %v71_v47, %v71_v47  ;;  %v2981_v50 = vld [vmem:[#allocation5 + $0x5b0] ss:$8 sps:$4 sm:$0xff]   ;;  %v2984_v53 = vld [vmem:[#allocation5 + $0x5c4] ss:$8 sps:$4 sm:$0xff]   ;;  %v2538_v54 = vcombine.high %v76_v51, %v76_v51  ;;  %v2986_v55 = vld [vmem:[#allocation5 + $0xc0] ss:$8 sps:$4 sm:$0xff]   ;;  %v2527_v7 = vcombine.low %v71_v47, %v71_v47  ;;  %v2537_v8 = vcombine.low %v76_v51, %v76_v51 }
  0x5d   :  { %2092 = vmatpush1.bf16.msra.mxu1 %v2938_v19  ;;  %v2987_v56 = vld [vmem:[#allocation5 + $0x5c0] ss:$8 sps:$4 sm:$0xff]   ;;  %v2988_v57 = vld [vmem:[#allocation5 + $0xd4] ss:$8 sps:$4 sm:$0xff]   ;;  %v2992_v59 = vld [vmem:[#allocation5 + $0xd0] ss:$8 sps:$4 sm:$0xff]  }
  0x5e   :  { %2297 = vmatpush1.bf16.msra.mxu0 %v2939_v20  ;;  %2093 = vmatprep.subr.bf16.mxu1 %v2940_v21  ;;  %v2990_v58 = vld [vmem:[#allocation5 + $0x5d4] ss:$8 sps:$4 sm:$0xff]   ;;  %v2993_v60 = vld [vmem:[#allocation5 + $0x5d0] ss:$8 sps:$4 sm:$0xff]   ;;  %v2994_v61 = vld [vmem:[#allocation5 + $0xe4] ss:$8 sps:$4 sm:$0xff]  }
  0x5f   :  { %2298 = vmatprep.subr.bf16.mxu0 %v2942_v22  ;;  %2115 = vmatprep.mubr.bf16.mxu1 %v2528_v49  ;;  %v2996_v62 = vld [vmem:[#allocation5 + $0x5e4] ss:$8 sps:$4 sm:$0xff]   ;;  %v2998_v63 = vld [vmem:[#allocation5 + $0xe0] ss:$8 sps:$4 sm:$0xff]   ;;  %v3000_v1 = vld [vmem:[#allocation5 + $0xf4] ss:$8 sps:$4 sm:$0xff]  }
  0x60   :  { %2320 = vmatprep.mubr.bf16.mxu0 %v2538_v54  ;;  %v2999_v0 = vld [vmem:[#allocation5 + $0x5e0] ss:$8 sps:$4 sm:$0xff]   ;;  %v3002_v2 = vld [vmem:[#allocation5 + $0x5f4] ss:$8 sps:$4 sm:$0xff]   ;;  %v3004_v3 = vld [vmem:[#allocation5 + $0xf0] ss:$8 sps:$4 sm:$0xff]  }
  0x61   :  { %2094 = vmatpush1.bf16.msra.mxu1 %v2944_v23  ;;  %v3005_v4 = vld [vmem:[#allocation5 + $0x5f0] ss:$8 sps:$4 sm:$0xff]   ;;  %v3010_v5 = vld [vmem:[#allocation5 + $0x104] ss:$8 sps:$4 sm:$0xff]   ;;  %v3008_v9 = vld [vmem:[#allocation5 + $0x100] ss:$8 sps:$4 sm:$0xff]  }
  0x62   :  { %2299 = vmatpush1.bf16.msra.mxu0 %v2945_v24  ;;  %2095 = vmatprep.subr.bf16.mxu1 %v2946_v25  ;;  %v3015_v6 = vld [vmem:[#allocation5 + $0x604] ss:$8 sps:$4 sm:$0xff]   ;;  %v3013_v10 = vld [vmem:[#allocation5 + $0x600] ss:$8 sps:$4 sm:$0xff]   ;;  %v3018_v11 = vld [vmem:[#allocation5 + $0x114] ss:$8 sps:$4 sm:$0xff]  }
  0x63   :  { %2300 = vmatprep.subr.bf16.mxu0 %v2948_v26  ;;  %v3021_v12 = vld [vmem:[#allocation5 + $0x614] ss:$8 sps:$4 sm:$0xff]   ;;  %v3016_v13 = vld [vmem:[#allocation5 + $0x110] ss:$8 sps:$4 sm:$0xff]   ;;  %v3024_v15 = vld [vmem:[#allocation5 + $0x124] ss:$8 sps:$4 sm:$0xff]  }
  0x64   :  { %v3019_v14 = vld [vmem:[#allocation5 + $0x610] ss:$8 sps:$4 sm:$0xff]   ;;  %v3027_v16 = vld [vmem:[#allocation5 + $0x624] ss:$8 sps:$4 sm:$0xff]   ;;  %v3022_v17 = vld [vmem:[#allocation5 + $0x120] ss:$8 sps:$4 sm:$0xff]  }
  0x65   :  { %2096 = vmatpush1.bf16.msra.mxu1 %v2950_v27  ;;  %v3025_v18 = vld [vmem:[#allocation5 + $0x620] ss:$8 sps:$4 sm:$0xff]   ;;  %v3030_v19 = vld [vmem:[#allocation5 + $0x134] ss:$8 sps:$4 sm:$0xff]   ;;  %v3028_v21 = vld [vmem:[#allocation5 + $0x130] ss:$8 sps:$4 sm:$0xff]  }
  0x66   :  { %2301 = vmatpush1.bf16.msra.mxu0 %v2951_v28  ;;  %2097 = vmatprep.subr.bf16.mxu1 %v2952_v29  ;;  %v3033_v20 = vld [vmem:[#allocation5 + $0x634] ss:$8 sps:$4 sm:$0xff]   ;;  %v3031_v22 = vld [vmem:[#allocation5 + $0x630] ss:$8 sps:$4 sm:$0xff]   ;;  %v3036_v23 = vld [vmem:[#allocation5 + $0x144] ss:$8 sps:$4 sm:$0xff]  }
  0x67   :  { %2302 = vmatprep.subr.bf16.mxu0 %v2954_v30  ;;  %v3039_v24 = vld [vmem:[#allocation5 + $0x644] ss:$8 sps:$4 sm:$0xff]   ;;  %v3034_v25 = vld [vmem:[#allocation5 + $0x140] ss:$8 sps:$4 sm:$0xff]   ;;  %v3042_v27 = vld [vmem:[#allocation5 + $0x154] ss:$8 sps:$4 sm:$0xff]  }
  0x68   :  { %v3037_v26 = vld [vmem:[#allocation5 + $0x640] ss:$8 sps:$4 sm:$0xff]   ;;  %v3045_v28 = vld [vmem:[#allocation5 + $0x654] ss:$8 sps:$4 sm:$0xff]   ;;  %v3040_v29 = vld [vmem:[#allocation5 + $0x150] ss:$8 sps:$4 sm:$0xff]  }
  0x69   :  { %2098 = vmatpush1.bf16.msra.mxu1 %v2956_v31  ;;  %v3043_v30 = vld [vmem:[#allocation5 + $0x650] ss:$8 sps:$4 sm:$0xff]   ;;  %v3048_v31 = vld [vmem:[#allocation5 + $0x164] ss:$8 sps:$4 sm:$0xff]   ;;  %v3066_v47 = vld [vmem:[#allocation5 + $0x194] ss:$8 sps:$4 sm:$0xff]  }
  0x6a   :  { %2303 = vmatpush1.bf16.msra.mxu0 %v2957_v32  ;;  %2099 = vmatprep.subr.bf16.mxu1 %v2958_v33  ;;  %v3051_v32 = vld [vmem:[#allocation5 + $0x664] ss:$8 sps:$4 sm:$0xff]   ;;  %v3591_v33 = vld [vmem:[#allocation3 + $0x8] sm:$0xff]  ;;  %v3073_v54 = vld [vmem:[#allocation5 + $0x6a0] ss:$8 sps:$4 sm:$0xff]  }
  0x6b   :  { %2304 = vmatprep.subr.bf16.mxu0 %v2960_v34  ;;  %v3046_v34 = vld [vmem:[#allocation5 + $0x160] ss:$8 sps:$4 sm:$0xff]   ;;  %v3064_v49 = vld [vmem:[#allocation5 + $0x190] ss:$8 sps:$4 sm:$0xff]   ;;  %v3072_v51 = vld [vmem:[#allocation5 + $0x1a4] ss:$8 sps:$4 sm:$0xff]  }
  0x6d   :  { %2100 = vmatpush1.bf16.msra.mxu1 %v2962_v35  ;;  %v3049_v35 = vld [vmem:[#allocation5 + $0x660] ss:$8 sps:$4 sm:$0xff]  }
  0x6e   :  { %2305 = vmatpush1.bf16.msra.mxu0 %v2963_v36  ;;  %2101 = vmatprep.subr.bf16.mxu1 %v2964_v37  ;;  %v2530_v36 = vcombine.high %v3591_v33, %v3591_v33  ;;  %v3595_v37 = vld [vmem:[#allocation3 + $0x30] sm:$0xff] }
  0x6f   :  { %2306 = vmatprep.subr.bf16.mxu0 %v2966_v38  ;;  %v3054_v38 = vld [vmem:[#allocation5 + $0x174] ss:$8 sps:$4 sm:$0xff]  }
  0x71   :  { %2102 = vmatpush1.bf16.msra.mxu1 %v2968_v39  ;;  %v2540_v39 = vcombine.high %v3595_v37, %v3595_v37 }
  0x72   :  { %2307 = vmatpush1.bf16.msra.mxu0 %v2969_v40  ;;  %2103 = vmatprep.subr.bf16.mxu1 %v2970_v41  ;;  %v3057_v40 = vld [vmem:[#allocation5 + $0x674] ss:$8 sps:$4 sm:$0xff]   ;;  %v3052_v41 = vld [vmem:[#allocation5 + $0x170] ss:$8 sps:$4 sm:$0xff]  }
  0x73   :  { %2308 = vmatprep.subr.bf16.mxu0 %v2972_v42  ;;  %v3055_v42 = vld [vmem:[#allocation5 + $0x670] ss:$8 sps:$4 sm:$0xff]  }
  0x75   :  { %2104 = vmatpush1.bf16.msra.mxu1 %v2974_v43  ;;  %v3060_v43 = vld [vmem:[#allocation5 + $0x184] ss:$8 sps:$4 sm:$0xff]  }
  0x76   :  { %2309 = vmatpush1.bf16.msra.mxu0 %v2975_v44  ;;  %2105 = vmatprep.subr.bf16.mxu1 %v2976_v45  ;;  %v3063_v44 = vld [vmem:[#allocation5 + $0x684] ss:$8 sps:$4 sm:$0xff]   ;;  %v3058_v45 = vld [vmem:[#allocation5 + $0x180] ss:$8 sps:$4 sm:$0xff]  }
  0x77   :  { %2310 = vmatprep.subr.bf16.mxu0 %v2978_v46  ;;  %v3061_v46 = vld [vmem:[#allocation5 + $0x680] ss:$8 sps:$4 sm:$0xff]  }
  0x79   :  { %2106 = vmatpush1.bf16.msra.mxu1 %v2980_v48  ;;  %v3069_v48 = vld [vmem:[#allocation5 + $0x694] ss:$8 sps:$4 sm:$0xff]  }
  0x7a   :  { %2311 = vmatpush1.bf16.msra.mxu0 %v2981_v50  ;;  %2107 = vmatprep.subr.bf16.mxu1 %v2982_v52  ;;  %v3067_v50 = vld [vmem:[#allocation5 + $0x690] ss:$8 sps:$4 sm:$0xff]   ;;  %v3075_v52 = vld [vmem:[#allocation5 + $0x6a4] ss:$8 sps:$4 sm:$0xff]  }
  0x7b   :  { %2312 = vmatprep.subr.bf16.mxu0 %v2984_v53  ;;  %v3070_v53 = vld [vmem:[#allocation5 + $0x1a0] ss:$8 sps:$4 sm:$0xff]  }
  0x7d   :  { %2108 = vmatpush1.bf16.msra.mxu1 %v2986_v55  ;;  %v3078_v55 = vld [vmem:[#allocation5 + $0x1b4] ss:$8 sps:$4 sm:$0xff]  }
  0x7e   :  { %2313 = vmatpush1.bf16.msra.mxu0 %v2987_v56  ;;  %2109 = vmatprep.subr.bf16.mxu1 %v2988_v57  ;;  %v3081_v56 = vld [vmem:[#allocation5 + $0x6b4] ss:$8 sps:$4 sm:$0xff]   ;;  %v3076_v57 = vld [vmem:[#allocation5 + $0x1b0] ss:$8 sps:$4 sm:$0xff]  }
  0x7f   :  { %2314 = vmatprep.subr.bf16.mxu0 %v2990_v58  ;;  %v3079_v58 = vld [vmem:[#allocation5 + $0x6b0] ss:$8 sps:$4 sm:$0xff]  }
  0x81   :  { %2110 = vmatpush1.bf16.msra.mxu1 %v2992_v59  ;;  %v3084_v59 = vld [vmem:[#allocation5 + $0x1c4] ss:$8 sps:$4 sm:$0xff]  }
  0x82   :  { %2315 = vmatpush1.bf16.msra.mxu0 %v2993_v60  ;;  %2111 = vmatprep.subr.bf16.mxu1 %v2994_v61  ;;  %v3087_v60 = vld [vmem:[#allocation5 + $0x6c4] ss:$8 sps:$4 sm:$0xff]   ;;  %v3082_v61 = vld [vmem:[#allocation5 + $0x1c0] ss:$8 sps:$4 sm:$0xff]  }
  0x83   :  { %2316 = vmatprep.subr.bf16.mxu0 %v2996_v62  ;;  %v3085_v62 = vld [vmem:[#allocation5 + $0x6c0] ss:$8 sps:$4 sm:$0xff]  }
  0x85   :  { %2112 = vmatpush1.bf16.msra.mxu1 %v2998_v63  ;;  %v3090_v63 = vld [vmem:[#allocation5 + $0x1d4] ss:$8 sps:$4 sm:$0xff]  }
  0x86   :  { %2317 = vmatpush1.bf16.msra.mxu0 %v2999_v0  ;;  %2113 = vmatprep.subr.bf16.mxu1 %v3000_v1  ;;  %v3093_v0 = vld [vmem:[#allocation5 + $0x6d4] ss:$8 sps:$4 sm:$0xff]   ;;  %v3088_v1 = vld [vmem:[#allocation5 + $0x1d0] ss:$8 sps:$4 sm:$0xff]  }
  0x87   :  { %2318 = vmatprep.subr.bf16.mxu0 %v3002_v2  ;;  %v3091_v2 = vld [vmem:[#allocation5 + $0x6d0] ss:$8 sps:$4 sm:$0xff]  }
  0x89   :  { %2114 = vmatpush1.bf16.msra.mxu1 %v3004_v3  ;;  %v3096_v3 = vld [vmem:[#allocation5 + $0x1e4] ss:$8 sps:$4 sm:$0xff]  }
  0x8a   :  { %2319 = vmatpush1.bf16.msra.mxu0 %v3005_v4  ;;  %2124 = vmatprep.subr.bf16.mxu1 %v3010_v5  ;;  %v3099_v4 = vld [vmem:[#allocation5 + $0x6e4] ss:$8 sps:$4 sm:$0xff]   ;;  %v3094_v5 = vld [vmem:[#allocation5 + $0x1e0] ss:$8 sps:$4 sm:$0xff]  }
  0x8b   :  { %2329 = vmatprep.subr.bf16.mxu0 %v3015_v6  ;;  %v3097_v6 = vld [vmem:[#allocation5 + $0x6e0] ss:$8 sps:$4 sm:$0xff]  }
  0x8c   :  { %2116 = vmatmul.mubr.bf16.vlgmr.msra.gmra.mrb[0].mxu1 %v2527_v7  ;;  %v3102_v7 = vld [vmem:[#allocation5 + $0x1f4] ss:$8 sps:$4 sm:$0xff]  }
  0x8d   :  { %2321 = vmatmul.mubr.bf16.vlgmr.msra.gmra.mrb[0].mxu0 %v2537_v8  ;;  %2125 = vmatpush1.bf16.msra.mxu1 %v3008_v9  ;;  %v3105_v8 = vld [vmem:[#allocation5 + $0x6f4] ss:$8 sps:$4 sm:$0xff]   ;;  %v3100_v9 = vld [vmem:[#allocation5 + $0x1f0] ss:$8 sps:$4 sm:$0xff]  }
  0x8e   :  { %2330 = vmatpush1.bf16.msra.mxu0 %v3013_v10  ;;  %2126 = vmatprep.subr.bf16.mxu1 %v3018_v11  ;;  %v3103_v10 = vld [vmem:[#allocation5 + $0x6f0] ss:$8 sps:$4 sm:$0xff]   ;;  %v3110_v11 = vld [vmem:[#allocation5 + $0x204] ss:$8 sps:$4 sm:$0xff]  }
  0x8f   :  { %2331 = vmatprep.subr.bf16.mxu0 %v3021_v12  ;;  %2156 = vmatprep.mubr.bf16.mxu1 %v2530_v36  ;;  %v3115_v12 = vld [vmem:[#allocation5 + $0x704] ss:$8 sps:$4 sm:$0xff]   ;;  %v3137_v36 = vld [vmem:[#allocation5 + $0x740] ss:$8 sps:$4 sm:$0xff]  }
  0x90   :  { %2361 = vmatprep.mubr.bf16.mxu0 %v2540_v39  ;;  %v3140_v39 = vld [vmem:[#allocation5 + $0x250] ss:$8 sps:$4 sm:$0xff]  }
  0x91   :  { %2127 = vmatpush1.bf16.msra.mxu1 %v3016_v13  ;;  %v2529_v13 = vcombine.low %v3591_v33, %v3591_v33  ;;  %v3136_v33 = vld [vmem:[#allocation5 + $0x244] ss:$8 sps:$4 sm:$0xff]  }
  0x92   :  { %2332 = vmatpush1.bf16.msra.mxu0 %v3019_v14  ;;  %2128 = vmatprep.subr.bf16.mxu1 %v3024_v15  ;;  %v3108_v14 = vld [vmem:[#allocation5 + $0x200] ss:$8 sps:$4 sm:$0xff]   ;;  %v2539_v15 = vcombine.low %v3595_v37, %v3595_v37  ;;  %v3142_v37 = vld [vmem:[#allocation5 + $0x254] ss:$8 sps:$4 sm:$0xff]  }
  0x93   :  { %2333 = vmatprep.subr.bf16.mxu0 %v3027_v16  ;;  %v3113_v16 = vld [vmem:[#allocation5 + $0x700] ss:$8 sps:$4 sm:$0xff]  }
  0x95   :  { %2129 = vmatpush1.bf16.msra.mxu1 %v3022_v17  ;;  %v3118_v17 = vld [vmem:[#allocation5 + $0x214] ss:$8 sps:$4 sm:$0xff]  }
  0x96   :  { %2334 = vmatpush1.bf16.msra.mxu0 %v3025_v18  ;;  %2130 = vmatprep.subr.bf16.mxu1 %v3030_v19  ;;  %v3121_v18 = vld [vmem:[#allocation5 + $0x714] ss:$8 sps:$4 sm:$0xff]   ;;  %v3603_v19 = vld [vmem:[#allocation3 + $0x10] sm:$0xff] }
  0x97   :  { %2335 = vmatprep.subr.bf16.mxu0 %v3033_v20  ;;  %v2532_v20 = vcombine.high %v3603_v19, %v3603_v19 }
  0x99   :  { %2131 = vmatpush1.bf16.msra.mxu1 %v3028_v21  ;;  %v3607_v21 = vld [vmem:[#allocation3 + $0x38] sm:$0xff] }
  0x9a   :  { %2336 = vmatpush1.bf16.msra.mxu0 %v3031_v22  ;;  %2132 = vmatprep.subr.bf16.mxu1 %v3036_v23  ;;  %v3116_v22 = vld [vmem:[#allocation5 + $0x210] ss:$8 sps:$4 sm:$0xff]  }
  0x9b   :  { %2337 = vmatprep.subr.bf16.mxu0 %v3039_v24  ;;  %v3119_v23 = vld [vmem:[#allocation5 + $0x710] ss:$8 sps:$4 sm:$0xff]   ;;  %v2542_v24 = vcombine.high %v3607_v21, %v3607_v21 }
  0x9d   :  { %2133 = vmatpush1.bf16.msra.mxu1 %v3034_v25  ;;  %v3124_v25 = vld [vmem:[#allocation5 + $0x224] ss:$8 sps:$4 sm:$0xff]  }
  0x9e   :  { %2338 = vmatpush1.bf16.msra.mxu0 %v3037_v26  ;;  %2134 = vmatprep.subr.bf16.mxu1 %v3042_v27  ;;  %v3127_v26 = vld [vmem:[#allocation5 + $0x724] ss:$8 sps:$4 sm:$0xff]   ;;  %v3122_v27 = vld [vmem:[#allocation5 + $0x220] ss:$8 sps:$4 sm:$0xff]  }
  0x9f   :  { %2339 = vmatprep.subr.bf16.mxu0 %v3045_v28  ;;  %v3125_v28 = vld [vmem:[#allocation5 + $0x720] ss:$8 sps:$4 sm:$0xff]  }
  0xa1   :  { %2135 = vmatpush1.bf16.msra.mxu1 %v3040_v29  ;;  %v3130_v29 = vld [vmem:[#allocation5 + $0x234] ss:$8 sps:$4 sm:$0xff]  }
  0xa2   :  { %2340 = vmatpush1.bf16.msra.mxu0 %v3043_v30  ;;  %2136 = vmatprep.subr.bf16.mxu1 %v3048_v31  ;;  %v3133_v30 = vld [vmem:[#allocation5 + $0x734] ss:$8 sps:$4 sm:$0xff]   ;;  %v3128_v31 = vld [vmem:[#allocation5 + $0x230] ss:$8 sps:$4 sm:$0xff]  }
  0xa3   :  { %2341 = vmatprep.subr.bf16.mxu0 %v3051_v32  ;;  %v3131_v32 = vld [vmem:[#allocation5 + $0x730] ss:$8 sps:$4 sm:$0xff]  }
  0xa5   :  { %2137 = vmatpush1.bf16.msra.mxu1 %v3046_v34  ;;  %v3139_v34 = vld [vmem:[#allocation5 + $0x744] ss:$8 sps:$4 sm:$0xff]  }
  0xa6   :  { %2342 = vmatpush1.bf16.msra.mxu0 %v3049_v35  ;;  %2138 = vmatprep.subr.bf16.mxu1 %v3054_v38  ;;  %v3134_v35 = vld [vmem:[#allocation5 + $0x240] ss:$8 sps:$4 sm:$0xff]   ;;  %v3145_v38 = vld [vmem:[#allocation5 + $0x754] ss:$8 sps:$4 sm:$0xff]  }
  0xa7   :  { %2343 = vmatprep.subr.bf16.mxu0 %v3057_v40  ;;  %v3143_v40 = vld [vmem:[#allocation5 + $0x750] ss:$8 sps:$4 sm:$0xff]  }
  0xa9   :  { %2139 = vmatpush1.bf16.msra.mxu1 %v3052_v41  ;;  %v3148_v41 = vld [vmem:[#allocation5 + $0x264] ss:$8 sps:$4 sm:$0xff]  }
  0xaa   :  { %2344 = vmatpush1.bf16.msra.mxu0 %v3055_v42  ;;  %2140 = vmatprep.subr.bf16.mxu1 %v3060_v43  ;;  %v3151_v42 = vld [vmem:[#allocation5 + $0x764] ss:$8 sps:$4 sm:$0xff]   ;;  %v3146_v43 = vld [vmem:[#allocation5 + $0x260] ss:$8 sps:$4 sm:$0xff]  }
  0xab   :  { %2345 = vmatprep.subr.bf16.mxu0 %v3063_v44  ;;  %v3149_v44 = vld [vmem:[#allocation5 + $0x760] ss:$8 sps:$4 sm:$0xff]  }
  0xad   :  { %2141 = vmatpush1.bf16.msra.mxu1 %v3058_v45  ;;  %v3154_v45 = vld [vmem:[#allocation5 + $0x274] ss:$8 sps:$4 sm:$0xff]  }
  0xae   :  { %2346 = vmatpush1.bf16.msra.mxu0 %v3061_v46  ;;  %2142 = vmatprep.subr.bf16.mxu1 %v3066_v47  ;;  %v3157_v46 = vld [vmem:[#allocation5 + $0x774] ss:$8 sps:$4 sm:$0xff]   ;;  %v3152_v47 = vld [vmem:[#allocation5 + $0x270] ss:$8 sps:$4 sm:$0xff]  }
  0xaf   :  { %2347 = vmatprep.subr.bf16.mxu0 %v3069_v48  ;;  %v3155_v48 = vld [vmem:[#allocation5 + $0x770] ss:$8 sps:$4 sm:$0xff]  }
  0xb1   :  { %2143 = vmatpush1.bf16.msra.mxu1 %v3064_v49  ;;  %v3160_v49 = vld [vmem:[#allocation5 + $0x284] ss:$8 sps:$4 sm:$0xff]  }
  0xb2   :  { %2348 = vmatpush1.bf16.msra.mxu0 %v3067_v50  ;;  %2144 = vmatprep.subr.bf16.mxu1 %v3072_v51  ;;  %v3163_v50 = vld [vmem:[#allocation5 + $0x784] ss:$8 sps:$4 sm:$0xff]   ;;  %v3158_v51 = vld [vmem:[#allocation5 + $0x280] ss:$8 sps:$4 sm:$0xff]  }
  0xb3   :  { %2349 = vmatprep.subr.bf16.mxu0 %v3075_v52  ;;  %v3161_v52 = vld [vmem:[#allocation5 + $0x780] ss:$8 sps:$4 sm:$0xff]  }
  0xb5   :  { %2145 = vmatpush1.bf16.msra.mxu1 %v3070_v53  ;;  %v3166_v53 = vld [vmem:[#allocation5 + $0x294] ss:$8 sps:$4 sm:$0xff]  }
  0xb6   :  { %2350 = vmatpush1.bf16.msra.mxu0 %v3073_v54  ;;  %2146 = vmatprep.subr.bf16.mxu1 %v3078_v55  ;;  %v3169_v54 = vld [vmem:[#allocation5 + $0x794] ss:$8 sps:$4 sm:$0xff]   ;;  %v3164_v55 = vld [vmem:[#allocation5 + $0x290] ss:$8 sps:$4 sm:$0xff]  }
  0xb7   :  { %2351 = vmatprep.subr.bf16.mxu0 %v3081_v56  ;;  %v3167_v56 = vld [vmem:[#allocation5 + $0x790] ss:$8 sps:$4 sm:$0xff]  }
  0xb9   :  { %2147 = vmatpush1.bf16.msra.mxu1 %v3076_v57  ;;  %v3172_v57 = vld [vmem:[#allocation5 + $0x2a4] ss:$8 sps:$4 sm:$0xff]  }
  0xba   :  { %2352 = vmatpush1.bf16.msra.mxu0 %v3079_v58  ;;  %2148 = vmatprep.subr.bf16.mxu1 %v3084_v59  ;;  %v3175_v58 = vld [vmem:[#allocation5 + $0x7a4] ss:$8 sps:$4 sm:$0xff]   ;;  %v3170_v59 = vld [vmem:[#allocation5 + $0x2a0] ss:$8 sps:$4 sm:$0xff]  }
  0xbb   :  { %2353 = vmatprep.subr.bf16.mxu0 %v3087_v60  ;;  %v3173_v60 = vld [vmem:[#allocation5 + $0x7a0] ss:$8 sps:$4 sm:$0xff]  }
  0xbd   :  { %2149 = vmatpush1.bf16.msra.mxu1 %v3082_v61  ;;  %v3178_v61 = vld [vmem:[#allocation5 + $0x2b4] ss:$8 sps:$4 sm:$0xff]  }
  0xbe   :  { %2354 = vmatpush1.bf16.msra.mxu0 %v3085_v62  ;;  %2150 = vmatprep.subr.bf16.mxu1 %v3090_v63  ;;  %v3181_v62 = vld [vmem:[#allocation5 + $0x7b4] ss:$8 sps:$4 sm:$0xff]   ;;  %v3176_v63 = vld [vmem:[#allocation5 + $0x2b0] ss:$8 sps:$4 sm:$0xff]  }
  0xbf   :  { %2355 = vmatprep.subr.bf16.mxu0 %v3093_v0  ;;  %v3179_v0 = vld [vmem:[#allocation5 + $0x7b0] ss:$8 sps:$4 sm:$0xff]  }
  0xc1   :  { %2151 = vmatpush1.bf16.msra.mxu1 %v3088_v1  ;;  %v3184_v1 = vld [vmem:[#allocation5 + $0x2c4] ss:$8 sps:$4 sm:$0xff]  }
  0xc2   :  { %2356 = vmatpush1.bf16.msra.mxu0 %v3091_v2  ;;  %2152 = vmatprep.subr.bf16.mxu1 %v3096_v3  ;;  %v3187_v2 = vld [vmem:[#allocation5 + $0x7c4] ss:$8 sps:$4 sm:$0xff]   ;;  %v3182_v3 = vld [vmem:[#allocation5 + $0x2c0] ss:$8 sps:$4 sm:$0xff]  }
  0xc3   :  { %2357 = vmatprep.subr.bf16.mxu0 %v3099_v4  ;;  %v3185_v4 = vld [vmem:[#allocation5 + $0x7c0] ss:$8 sps:$4 sm:$0xff]  }
  0xc5   :  { %2153 = vmatpush1.bf16.msra.mxu1 %v3094_v5  ;;  %v3190_v5 = vld [vmem:[#allocation5 + $0x2d4] ss:$8 sps:$4 sm:$0xff]  }
  0xc6   :  { %2358 = vmatpush1.bf16.msra.mxu0 %v3097_v6  ;;  %2154 = vmatprep.subr.bf16.mxu1 %v3102_v7  ;;  %v3193_v6 = vld [vmem:[#allocation5 + $0x7d4] ss:$8 sps:$4 sm:$0xff]   ;;  %v3188_v7 = vld [vmem:[#allocation5 + $0x2d0] ss:$8 sps:$4 sm:$0xff]  }
  0xc7   :  { %2359 = vmatprep.subr.bf16.mxu0 %v3105_v8  ;;  %v3191_v8 = vld [vmem:[#allocation5 + $0x7d0] ss:$8 sps:$4 sm:$0xff]  }
  0xc9   :  { %2155 = vmatpush1.bf16.msra.mxu1 %v3100_v9  ;;  %v3196_v9 = vld [vmem:[#allocation5 + $0x2e4] ss:$8 sps:$4 sm:$0xff]  }
  0xca   :  { %2360 = vmatpush1.bf16.msra.mxu0 %v3103_v10  ;;  %2165 = vmatprep.subr.bf16.mxu1 %v3110_v11  ;;  %v3199_v10 = vld [vmem:[#allocation5 + $0x7e4] ss:$8 sps:$4 sm:$0xff]   ;;  %v3194_v11 = vld [vmem:[#allocation5 + $0x2e0] ss:$8 sps:$4 sm:$0xff]  }
  0xcb   :  { %2370 = vmatprep.subr.bf16.mxu0 %v3115_v12  ;;  %v3197_v12 = vld [vmem:[#allocation5 + $0x7e0] ss:$8 sps:$4 sm:$0xff]  }
  0xcc   :  { %2157 = vmatmul.mubr.bf16.vlgmr.msra.gmra.mrb[0].mxu1 %v2529_v13  ;;  %v3202_v13 = vld [vmem:[#allocation5 + $0x2f4] ss:$8 sps:$4 sm:$0xff]  }
  0xcd   :  { %2362 = vmatmul.mubr.bf16.vlgmr.msra.gmra.mrb[0].mxu0 %v2539_v15  ;;  %2166 = vmatpush1.bf16.msra.mxu1 %v3108_v14  ;;  %v3205_v14 = vld [vmem:[#allocation5 + $0x7f4] ss:$8 sps:$4 sm:$0xff]   ;;  %v3200_v15 = vld [vmem:[#allocation5 + $0x2f0] ss:$8 sps:$4 sm:$0xff]  }
  0xce   :  { %2371 = vmatpush1.bf16.msra.mxu0 %v3113_v16  ;;  %2167 = vmatprep.subr.bf16.mxu1 %v3118_v17  ;;  %v3203_v16 = vld [vmem:[#allocation5 + $0x7f0] ss:$8 sps:$4 sm:$0xff]   ;;  %v3210_v17 = vld [vmem:[#allocation5 + $0x304] ss:$8 sps:$4 sm:$0xff]  }
  0xcf   :  { %2372 = vmatprep.subr.bf16.mxu0 %v3121_v18  ;;  %2197 = vmatprep.mubr.bf16.mxu1 %v2532_v20  ;;  %v3215_v18 = vld [vmem:[#allocation5 + $0x804] ss:$8 sps:$4 sm:$0xff]   ;;  %v3208_v20 = vld [vmem:[#allocation5 + $0x300] ss:$8 sps:$4 sm:$0xff]  }
  0xd0   :  { %2402 = vmatprep.mubr.bf16.mxu0 %v2542_v24  ;;  %v2541_v24 = vcombine.low %v3607_v21, %v3607_v21  ;;  %v3219_v21 = vld [vmem:[#allocation5 + $0x810] ss:$8 sps:$4 sm:$0xff]  }
  0xd1   :  { %2168 = vmatpush1.bf16.msra.mxu1 %v3116_v22  ;;  %v3213_v22 = vld [vmem:[#allocation5 + $0x800] ss:$8 sps:$4 sm:$0xff]  }
  0xd2   :  { %2373 = vmatpush1.bf16.msra.mxu0 %v3119_v23  ;;  %2169 = vmatprep.subr.bf16.mxu1 %v3124_v25  ;;  %v2531_v23 = vcombine.low %v3603_v19, %v3603_v19  ;;  %v3615_v25 = vld [vmem:[#allocation3 + $0x18] sm:$0xff]  ;;  %v3216_v19 = vld [vmem:[#allocation5 + $0x310] ss:$8 sps:$4 sm:$0xff]  }
  0xd3   :  { %2374 = vmatprep.subr.bf16.mxu0 %v3127_v26  ;;  %v3617_v26 = vld [vmem:[#allocation3 + $0x40] sm:$0xff] }
  0xd5   :  { %2170 = vmatpush1.bf16.msra.mxu1 %v3122_v27  ;;  %v3218_v27 = vld [vmem:[#allocation5 + $0x314] ss:$8 sps:$4 sm:$0xff]  }
  0xd6   :  { %2375 = vmatpush1.bf16.msra.mxu0 %v3125_v28  ;;  %2171 = vmatprep.subr.bf16.mxu1 %v3130_v29  ;;  %v3221_v28 = vld [vmem:[#allocation5 + $0x814] ss:$8 sps:$4 sm:$0xff]   ;;  %v2534_v29 = vcombine.high %v3615_v25, %v3615_v25 }
  0xd7   :  { %2376 = vmatprep.subr.bf16.mxu0 %v3133_v30  ;;  %v2544_v30 = vcombine.high %v3617_v26, %v3617_v26 }
  0xd9   :  { %2172 = vmatpush1.bf16.msra.mxu1 %v3128_v31  ;;  %v3224_v31 = vld [vmem:[#allocation5 + $0x324] ss:$8 sps:$4 sm:$0xff]  }
  0xda   :  { %2377 = vmatpush1.bf16.msra.mxu0 %v3131_v32  ;;  %2173 = vmatprep.subr.bf16.mxu1 %v3136_v33  ;;  %v3227_v32 = vld [vmem:[#allocation5 + $0x824] ss:$8 sps:$4 sm:$0xff]   ;;  %v3222_v33 = vld [vmem:[#allocation5 + $0x320] ss:$8 sps:$4 sm:$0xff]  }
  0xdb   :  { %2378 = vmatprep.subr.bf16.mxu0 %v3139_v34  ;;  %v3225_v34 = vld [vmem:[#allocation5 + $0x820] ss:$8 sps:$4 sm:$0xff]  }
  0xdd   :  { %2174 = vmatpush1.bf16.msra.mxu1 %v3134_v35  ;;  %v3230_v35 = vld [vmem:[#allocation5 + $0x334] ss:$8 sps:$4 sm:$0xff]  }
  0xde   :  { %2379 = vmatpush1.bf16.msra.mxu0 %v3137_v36  ;;  %2175 = vmatprep.subr.bf16.mxu1 %v3142_v37  ;;  %v3233_v36 = vld [vmem:[#allocation5 + $0x834] ss:$8 sps:$4 sm:$0xff]   ;;  %v3228_v37 = vld [vmem:[#allocation5 + $0x330] ss:$8 sps:$4 sm:$0xff]  }
  0xdf   :  { %2380 = vmatprep.subr.bf16.mxu0 %v3145_v38  ;;  %v3231_v38 = vld [vmem:[#allocation5 + $0x830] ss:$8 sps:$4 sm:$0xff]  }
  0xe1   :  { %2176 = vmatpush1.bf16.msra.mxu1 %v3140_v39  ;;  %v3236_v39 = vld [vmem:[#allocation5 + $0x344] ss:$8 sps:$4 sm:$0xff]  }
  0xe2   :  { %2381 = vmatpush1.bf16.msra.mxu0 %v3143_v40  ;;  %2177 = vmatprep.subr.bf16.mxu1 %v3148_v41  ;;  %v3239_v40 = vld [vmem:[#allocation5 + $0x844] ss:$8 sps:$4 sm:$0xff]   ;;  %v3234_v41 = vld [vmem:[#allocation5 + $0x340] ss:$8 sps:$4 sm:$0xff]  }
  0xe3   :  { %2382 = vmatprep.subr.bf16.mxu0 %v3151_v42  ;;  %v3237_v42 = vld [vmem:[#allocation5 + $0x840] ss:$8 sps:$4 sm:$0xff]  }
  0xe5   :  { %2178 = vmatpush1.bf16.msra.mxu1 %v3146_v43  ;;  %v3242_v43 = vld [vmem:[#allocation5 + $0x354] ss:$8 sps:$4 sm:$0xff]  }
  0xe6   :  { %2383 = vmatpush1.bf16.msra.mxu0 %v3149_v44  ;;  %2179 = vmatprep.subr.bf16.mxu1 %v3154_v45  ;;  %v3245_v44 = vld [vmem:[#allocation5 + $0x854] ss:$8 sps:$4 sm:$0xff]   ;;  %v3240_v45 = vld [vmem:[#allocation5 + $0x350] ss:$8 sps:$4 sm:$0xff]  }
  0xe7   :  { %2384 = vmatprep.subr.bf16.mxu0 %v3157_v46  ;;  %v3243_v46 = vld [vmem:[#allocation5 + $0x850] ss:$8 sps:$4 sm:$0xff]  }
  0xe9   :  { %2180 = vmatpush1.bf16.msra.mxu1 %v3152_v47  ;;  %v3248_v47 = vld [vmem:[#allocation5 + $0x364] ss:$8 sps:$4 sm:$0xff]  }
  0xea   :  { %2385 = vmatpush1.bf16.msra.mxu0 %v3155_v48  ;;  %2181 = vmatprep.subr.bf16.mxu1 %v3160_v49  ;;  %v3251_v48 = vld [vmem:[#allocation5 + $0x864] ss:$8 sps:$4 sm:$0xff]   ;;  %v3246_v49 = vld [vmem:[#allocation5 + $0x360] ss:$8 sps:$4 sm:$0xff]  }
  0xeb   :  { %2386 = vmatprep.subr.bf16.mxu0 %v3163_v50  ;;  %v3249_v50 = vld [vmem:[#allocation5 + $0x860] ss:$8 sps:$4 sm:$0xff]  }
  0xed   :  { %2182 = vmatpush1.bf16.msra.mxu1 %v3158_v51  ;;  %v3254_v51 = vld [vmem:[#allocation5 + $0x374] ss:$8 sps:$4 sm:$0xff]  }
  0xee   :  { %2387 = vmatpush1.bf16.msra.mxu0 %v3161_v52  ;;  %2183 = vmatprep.subr.bf16.mxu1 %v3166_v53  ;;  %v3257_v52 = vld [vmem:[#allocation5 + $0x874] ss:$8 sps:$4 sm:$0xff]   ;;  %v3252_v53 = vld [vmem:[#allocation5 + $0x370] ss:$8 sps:$4 sm:$0xff]  }
  0xef   :  { %2388 = vmatprep.subr.bf16.mxu0 %v3169_v54  ;;  %v3255_v54 = vld [vmem:[#allocation5 + $0x870] ss:$8 sps:$4 sm:$0xff]  }
  0xf1   :  { %2184 = vmatpush1.bf16.msra.mxu1 %v3164_v55  ;;  %v3260_v55 = vld [vmem:[#allocation5 + $0x384] ss:$8 sps:$4 sm:$0xff]  }
  0xf2   :  { %2389 = vmatpush1.bf16.msra.mxu0 %v3167_v56  ;;  %2185 = vmatprep.subr.bf16.mxu1 %v3172_v57  ;;  %v3263_v56 = vld [vmem:[#allocation5 + $0x884] ss:$8 sps:$4 sm:$0xff]   ;;  %v3258_v57 = vld [vmem:[#allocation5 + $0x380] ss:$8 sps:$4 sm:$0xff]  }
  0xf3   :  { %2390 = vmatprep.subr.bf16.mxu0 %v3175_v58  ;;  %v3261_v58 = vld [vmem:[#allocation5 + $0x880] ss:$8 sps:$4 sm:$0xff]  }
  0xf5   :  { %2186 = vmatpush1.bf16.msra.mxu1 %v3170_v59  ;;  %v3266_v59 = vld [vmem:[#allocation5 + $0x394] ss:$8 sps:$4 sm:$0xff]  }
  0xf6   :  { %2391 = vmatpush1.bf16.msra.mxu0 %v3173_v60  ;;  %2187 = vmatprep.subr.bf16.mxu1 %v3178_v61  ;;  %v3269_v60 = vld [vmem:[#allocation5 + $0x894] ss:$8 sps:$4 sm:$0xff]   ;;  %v3264_v61 = vld [vmem:[#allocation5 + $0x390] ss:$8 sps:$4 sm:$0xff]  }
  0xf7   :  { %2392 = vmatprep.subr.bf16.mxu0 %v3181_v62  ;;  %v3267_v62 = vld [vmem:[#allocation5 + $0x890] ss:$8 sps:$4 sm:$0xff]  }
  0xf9   :  { %2188 = vmatpush1.bf16.msra.mxu1 %v3176_v63  ;;  %v3272_v63 = vld [vmem:[#allocation5 + $0x3a4] ss:$8 sps:$4 sm:$0xff]  }
  0xfa   :  { %2393 = vmatpush1.bf16.msra.mxu0 %v3179_v0  ;;  %2189 = vmatprep.subr.bf16.mxu1 %v3184_v1  ;;  %v3275_v0 = vld [vmem:[#allocation5 + $0x8a4] ss:$8 sps:$4 sm:$0xff]   ;;  %v3270_v1 = vld [vmem:[#allocation5 + $0x3a0] ss:$8 sps:$4 sm:$0xff]  }
  0xfb   :  { %2394 = vmatprep.subr.bf16.mxu0 %v3187_v2  ;;  %v3273_v2 = vld [vmem:[#allocation5 + $0x8a0] ss:$8 sps:$4 sm:$0xff]  }
  0xfd   :  { %2190 = vmatpush1.bf16.msra.mxu1 %v3182_v3  ;;  %v3278_v3 = vld [vmem:[#allocation5 + $0x3b4] ss:$8 sps:$4 sm:$0xff]  }
  0xfe   :  { %2395 = vmatpush1.bf16.msra.mxu0 %v3185_v4  ;;  %2191 = vmatprep.subr.bf16.mxu1 %v3190_v5  ;;  %v3281_v4 = vld [vmem:[#allocation5 + $0x8b4] ss:$8 sps:$4 sm:$0xff]   ;;  %v3276_v5 = vld [vmem:[#allocation5 + $0x3b0] ss:$8 sps:$4 sm:$0xff]  }
  0xff   :  { %2396 = vmatprep.subr.bf16.mxu0 %v3193_v6  ;;  %v3279_v6 = vld [vmem:[#allocation5 + $0x8b0] ss:$8 sps:$4 sm:$0xff]  }
 0x101   :  { %2192 = vmatpush1.bf16.msra.mxu1 %v3188_v7  ;;  %v3284_v7 = vld [vmem:[#allocation5 + $0x3c4] ss:$8 sps:$4 sm:$0xff]  }
 0x102   :  { %2397 = vmatpush1.bf16.msra.mxu0 %v3191_v8  ;;  %2193 = vmatprep.subr.bf16.mxu1 %v3196_v9  ;;  %v3287_v8 = vld [vmem:[#allocation5 + $0x8c4] ss:$8 sps:$4 sm:$0xff]   ;;  %v3282_v9 = vld [vmem:[#allocation5 + $0x3c0] ss:$8 sps:$4 sm:$0xff]  }
 0x103   :  { %2398 = vmatprep.subr.bf16.mxu0 %v3199_v10  ;;  %v3285_v10 = vld [vmem:[#allocation5 + $0x8c0] ss:$8 sps:$4 sm:$0xff]  }
 0x105   :  { %2194 = vmatpush1.bf16.msra.mxu1 %v3194_v11  ;;  %v3290_v11 = vld [vmem:[#allocation5 + $0x3d4] ss:$8 sps:$4 sm:$0xff]  }
 0x106   :  { %2399 = vmatpush1.bf16.msra.mxu0 %v3197_v12  ;;  %2195 = vmatprep.subr.bf16.mxu1 %v3202_v13  ;;  %v3293_v12 = vld [vmem:[#allocation5 + $0x8d4] ss:$8 sps:$4 sm:$0xff]   ;;  %v3288_v13 = vld [vmem:[#allocation5 + $0x3d0] ss:$8 sps:$4 sm:$0xff]  }
 0x107   :  { %2400 = vmatprep.subr.bf16.mxu0 %v3205_v14  ;;  %v3291_v14 = vld [vmem:[#allocation5 + $0x8d0] ss:$8 sps:$4 sm:$0xff]  }
 0x109   :  { %2196 = vmatpush1.bf16.msra.mxu1 %v3200_v15  ;;  %v3296_v15 = vld [vmem:[#allocation5 + $0x3e4] ss:$8 sps:$4 sm:$0xff]  }
 0x10a   :  { %2401 = vmatpush1.bf16.msra.mxu0 %v3203_v16  ;;  %2206 = vmatprep.subr.bf16.mxu1 %v3210_v17  ;;  %v3299_v16 = vld [vmem:[#allocation5 + $0x8e4] ss:$8 sps:$4 sm:$0xff]   ;;  %v3294_v17 = vld [vmem:[#allocation5 + $0x3e0] ss:$8 sps:$4 sm:$0xff]  }
 0x10b   :  { %2411 = vmatprep.subr.bf16.mxu0 %v3215_v18  ;;  %v3297_v18 = vld [vmem:[#allocation5 + $0x8e0] ss:$8 sps:$4 sm:$0xff]  }
 0x10c   :  { %2198 = vmatmul.mubr.bf16.vlgmr.msra.gmra.mrb[0].mxu1 %v2531_v23  ;;  %v3300_v23 = vld [vmem:[#allocation5 + $0x3f0] ss:$8 sps:$4 sm:$0xff]  }
 0x10d   :  { %2403 = vmatmul.mubr.bf16.vlgmr.msra.gmra.mrb[0].mxu0 %v2541_v24  ;;  %2207 = vmatpush1.bf16.msra.mxu1 %v3208_v20  ;;  %v3302_v20 = vld [vmem:[#allocation5 + $0x3f4] ss:$8 sps:$4 sm:$0xff]   ;;  %v3303_v24 = vld [vmem:[#allocation5 + $0x8f0] ss:$8 sps:$4 sm:$0xff]  }
 0x10e   :  { %2412 = vmatpush1.bf16.msra.mxu0 %v3213_v22  ;;  %2208 = vmatprep.subr.bf16.mxu1 %v3218_v27  ;;  %v3305_v22 = vld [vmem:[#allocation5 + $0x8f4] ss:$8 sps:$4 sm:$0xff]   ;;  %v3310_v27 = vld [vmem:[#allocation5 + $0x404] ss:$8 sps:$4 sm:$0xff]  }
 0x10f   :  { %2413 = vmatprep.subr.bf16.mxu0 %v3221_v28  ;;  %2238 = vmatprep.mubr.bf16.mxu1 %v2534_v29  ;;  %v3315_v28 = vld [vmem:[#allocation5 + $0x904] ss:$8 sps:$4 sm:$0xff]   ;;  %v2533_v29 = vcombine.low %v3615_v25, %v3615_v25 }
 0x110   :  { %2443 = vmatprep.mubr.bf16.mxu0 %v2544_v30  ;;  %v2543_v30 = vcombine.low %v3617_v26, %v3617_v26  ;;  %v3316_v26 = vld [vmem:[#allocation5 + $0x410] ss:$8 sps:$4 sm:$0xff]  }
 0x111   :  { %2209 = vmatpush1.bf16.msra.mxu1 %v3216_v19  ;;  %v3627_v19 = vld [vmem:[#allocation3 + $0x20] sm:$0xff] }
 0x112   :  { %2414 = vmatpush1.bf16.msra.mxu0 %v3219_v21  ;;  %2210 = vmatprep.subr.bf16.mxu1 %v3224_v31  ;;  %v3629_v21 = vld [vmem:[#allocation3 + $0x48] sm:$0xff]  ;;  %v3308_v31 = vld [vmem:[#allocation5 + $0x400] ss:$8 sps:$4 sm:$0xff]  }
 0x113   :  { %2415 = vmatprep.subr.bf16.mxu0 %v3227_v32  ;;  %v3313_v32 = vld [vmem:[#allocation5 + $0x900] ss:$8 sps:$4 sm:$0xff]   ;;  %v2546_v25 = vcombine.high %v3629_v21, %v3629_v21 }
 0x115   :  { %2211 = vmatpush1.bf16.msra.mxu1 %v3222_v33  ;;  %v3318_v33 = vld [vmem:[#allocation5 + $0x414] ss:$8 sps:$4 sm:$0xff]  }
 0x116   :  { %2416 = vmatpush1.bf16.msra.mxu0 %v3225_v34  ;;  %2212 = vmatprep.subr.bf16.mxu1 %v3230_v35  ;;  %v3321_v34 = vld [vmem:[#allocation5 + $0x914] ss:$8 sps:$4 sm:$0xff]   ;;  %v2536_v35 = vcombine.high %v3627_v19, %v3627_v19 }
 0x117   :  { %2417 = vmatprep.subr.bf16.mxu0 %v3233_v36  ;;  %v3319_v36 = vld [vmem:[#allocation5 + $0x910] ss:$8 sps:$4 sm:$0xff]  }
 0x119   :  { %2213 = vmatpush1.bf16.msra.mxu1 %v3228_v37  ;;  %v3324_v37 = vld [vmem:[#allocation5 + $0x424] ss:$8 sps:$4 sm:$0xff]  }
 0x11a   :  { %2418 = vmatpush1.bf16.msra.mxu0 %v3231_v38  ;;  %2214 = vmatprep.subr.bf16.mxu1 %v3236_v39  ;;  %v3327_v38 = vld [vmem:[#allocation5 + $0x924] ss:$8 sps:$4 sm:$0xff]   ;;  %v3322_v39 = vld [vmem:[#allocation5 + $0x420] ss:$8 sps:$4 sm:$0xff]  }
 0x11b   :  { %2419 = vmatprep.subr.bf16.mxu0 %v3239_v40  ;;  %v3325_v40 = vld [vmem:[#allocation5 + $0x920] ss:$8 sps:$4 sm:$0xff]  }
 0x11d   :  { %2215 = vmatpush1.bf16.msra.mxu1 %v3234_v41  ;;  %v3330_v41 = vld [vmem:[#allocation5 + $0x434] ss:$8 sps:$4 sm:$0xff]  }
 0x11e   :  { %2420 = vmatpush1.bf16.msra.mxu0 %v3237_v42  ;;  %2216 = vmatprep.subr.bf16.mxu1 %v3242_v43  ;;  %v3333_v42 = vld [vmem:[#allocation5 + $0x934] ss:$8 sps:$4 sm:$0xff]   ;;  %v3328_v43 = vld [vmem:[#allocation5 + $0x430] ss:$8 sps:$4 sm:$0xff]  }
 0x11f   :  { %2421 = vmatprep.subr.bf16.mxu0 %v3245_v44  ;;  %v3331_v44 = vld [vmem:[#allocation5 + $0x930] ss:$8 sps:$4 sm:$0xff]  }
 0x121   :  { %2217 = vmatpush1.bf16.msra.mxu1 %v3240_v45  ;;  %v3336_v45 = vld [vmem:[#allocation5 + $0x444] ss:$8 sps:$4 sm:$0xff]  }
 0x122   :  { %2422 = vmatpush1.bf16.msra.mxu0 %v3243_v46  ;;  %2218 = vmatprep.subr.bf16.mxu1 %v3248_v47  ;;  %v3339_v46 = vld [vmem:[#allocation5 + $0x944] ss:$8 sps:$4 sm:$0xff]   ;;  %v3334_v47 = vld [vmem:[#allocation5 + $0x440] ss:$8 sps:$4 sm:$0xff]  }
 0x123   :  { %2423 = vmatprep.subr.bf16.mxu0 %v3251_v48  ;;  %v3337_v48 = vld [vmem:[#allocation5 + $0x940] ss:$8 sps:$4 sm:$0xff]  }
 0x125   :  { %2219 = vmatpush1.bf16.msra.mxu1 %v3246_v49  ;;  %v3342_v49 = vld [vmem:[#allocation5 + $0x454] ss:$8 sps:$4 sm:$0xff]  }
 0x126   :  { %2424 = vmatpush1.bf16.msra.mxu0 %v3249_v50  ;;  %2220 = vmatprep.subr.bf16.mxu1 %v3254_v51  ;;  %v3345_v50 = vld [vmem:[#allocation5 + $0x954] ss:$8 sps:$4 sm:$0xff]   ;;  %v3340_v51 = vld [vmem:[#allocation5 + $0x450] ss:$8 sps:$4 sm:$0xff]  }
 0x127   :  { %2425 = vmatprep.subr.bf16.mxu0 %v3257_v52  ;;  %v3343_v52 = vld [vmem:[#allocation5 + $0x950] ss:$8 sps:$4 sm:$0xff]  }
 0x129   :  { %2221 = vmatpush1.bf16.msra.mxu1 %v3252_v53  ;;  %v3348_v53 = vld [vmem:[#allocation5 + $0x464] ss:$8 sps:$4 sm:$0xff]  }
 0x12a   :  { %2426 = vmatpush1.bf16.msra.mxu0 %v3255_v54  ;;  %2222 = vmatprep.subr.bf16.mxu1 %v3260_v55  ;;  %v3351_v54 = vld [vmem:[#allocation5 + $0x964] ss:$8 sps:$4 sm:$0xff]   ;;  %v3346_v55 = vld [vmem:[#allocation5 + $0x460] ss:$8 sps:$4 sm:$0xff]  }
 0x12b   :  { %2427 = vmatprep.subr.bf16.mxu0 %v3263_v56  ;;  %v3349_v56 = vld [vmem:[#allocation5 + $0x960] ss:$8 sps:$4 sm:$0xff]  }
 0x12d   :  { %2223 = vmatpush1.bf16.msra.mxu1 %v3258_v57  ;;  %v3354_v57 = vld [vmem:[#allocation5 + $0x474] ss:$8 sps:$4 sm:$0xff]  }
 0x12e   :  { %2428 = vmatpush1.bf16.msra.mxu0 %v3261_v58  ;;  %2224 = vmatprep.subr.bf16.mxu1 %v3266_v59  ;;  %v3357_v58 = vld [vmem:[#allocation5 + $0x974] ss:$8 sps:$4 sm:$0xff]   ;;  %v3352_v59 = vld [vmem:[#allocation5 + $0x470] ss:$8 sps:$4 sm:$0xff]  }
 0x12f   :  { %2429 = vmatprep.subr.bf16.mxu0 %v3269_v60  ;;  %v3355_v60 = vld [vmem:[#allocation5 + $0x970] ss:$8 sps:$4 sm:$0xff]  }
 0x131   :  { %2225 = vmatpush1.bf16.msra.mxu1 %v3264_v61  ;;  %v3360_v61 = vld [vmem:[#allocation5 + $0x484] ss:$8 sps:$4 sm:$0xff]  }
 0x132   :  { %2430 = vmatpush1.bf16.msra.mxu0 %v3267_v62  ;;  %2226 = vmatprep.subr.bf16.mxu1 %v3272_v63  ;;  %v3363_v62 = vld [vmem:[#allocation5 + $0x984] ss:$8 sps:$4 sm:$0xff]   ;;  %v3358_v63 = vld [vmem:[#allocation5 + $0x480] ss:$8 sps:$4 sm:$0xff]  }
 0x133   :  { %2431 = vmatprep.subr.bf16.mxu0 %v3275_v0  ;;  %v3361_v0 = vld [vmem:[#allocation5 + $0x980] ss:$8 sps:$4 sm:$0xff]  }
 0x135   :  { %2227 = vmatpush1.bf16.msra.mxu1 %v3270_v1  ;;  %v3366_v1 = vld [vmem:[#allocation5 + $0x494] ss:$8 sps:$4 sm:$0xff]  }
 0x136   :  { %2432 = vmatpush1.bf16.msra.mxu0 %v3273_v2  ;;  %2228 = vmatprep.subr.bf16.mxu1 %v3278_v3  ;;  %v3369_v2 = vld [vmem:[#allocation5 + $0x994] ss:$8 sps:$4 sm:$0xff]   ;;  %v3364_v3 = vld [vmem:[#allocation5 + $0x490] ss:$8 sps:$4 sm:$0xff]  }
 0x137   :  { %2433 = vmatprep.subr.bf16.mxu0 %v3281_v4  ;;  %v3367_v4 = vld [vmem:[#allocation5 + $0x990] ss:$8 sps:$4 sm:$0xff]  }
 0x139   :  { %2229 = vmatpush1.bf16.msra.mxu1 %v3276_v5  ;;  %v3372_v5 = vld [vmem:[#allocation5 + $0x4a4] ss:$8 sps:$4 sm:$0xff]  }
 0x13a   :  { %2434 = vmatpush1.bf16.msra.mxu0 %v3279_v6  ;;  %2230 = vmatprep.subr.bf16.mxu1 %v3284_v7  ;;  %v3375_v6 = vld [vmem:[#allocation5 + $0x9a4] ss:$8 sps:$4 sm:$0xff]   ;;  %v3370_v7 = vld [vmem:[#allocation5 + $0x4a0] ss:$8 sps:$4 sm:$0xff]  }
 0x13b   :  { %2435 = vmatprep.subr.bf16.mxu0 %v3287_v8  ;;  %v3373_v8 = vld [vmem:[#allocation5 + $0x9a0] ss:$8 sps:$4 sm:$0xff]  }
 0x13d   :  { %2231 = vmatpush1.bf16.msra.mxu1 %v3282_v9  ;;  %v3378_v9 = vld [vmem:[#allocation5 + $0x4b4] ss:$8 sps:$4 sm:$0xff]  }
 0x13e   :  { %2436 = vmatpush1.bf16.msra.mxu0 %v3285_v10  ;;  %2232 = vmatprep.subr.bf16.mxu1 %v3290_v11  ;;  %v3381_v10 = vld [vmem:[#allocation5 + $0x9b4] ss:$8 sps:$4 sm:$0xff]   ;;  %v3376_v11 = vld [vmem:[#allocation5 + $0x4b0] ss:$8 sps:$4 sm:$0xff]  }
 0x13f   :  { %2437 = vmatprep.subr.bf16.mxu0 %v3293_v12  ;;  %v3379_v12 = vld [vmem:[#allocation5 + $0x9b0] ss:$8 sps:$4 sm:$0xff]  }
 0x141   :  { %2233 = vmatpush1.bf16.msra.mxu1 %v3288_v13  ;;  %v3384_v13 = vld [vmem:[#allocation5 + $0x4c4] ss:$8 sps:$4 sm:$0xff]  }
 0x142   :  { %2438 = vmatpush1.bf16.msra.mxu0 %v3291_v14  ;;  %2234 = vmatprep.subr.bf16.mxu1 %v3296_v15  ;;  %v3387_v14 = vld [vmem:[#allocation5 + $0x9c4] ss:$8 sps:$4 sm:$0xff]   ;;  %v3382_v15 = vld [vmem:[#allocation5 + $0x4c0] ss:$8 sps:$4 sm:$0xff]  }
 0x143   :  { %2439 = vmatprep.subr.bf16.mxu0 %v3299_v16  ;;  %v3385_v16 = vld [vmem:[#allocation5 + $0x9c0] ss:$8 sps:$4 sm:$0xff]  }
 0x145   :  { %2235 = vmatpush1.bf16.msra.mxu1 %v3294_v17  ;;  %v3390_v17 = vld [vmem:[#allocation5 + $0x4d4] ss:$8 sps:$4 sm:$0xff]  }
 0x146   :  { %2440 = vmatpush1.bf16.msra.mxu0 %v3297_v18  ;;  %2236 = vmatprep.subr.bf16.mxu1 %v3302_v20  ;;  %v3393_v18 = vld [vmem:[#allocation5 + $0x9d4] ss:$8 sps:$4 sm:$0xff]   ;;  %v3388_v20 = vld [vmem:[#allocation5 + $0x4d0] ss:$8 sps:$4 sm:$0xff]  }
 0x147   :  { %2441 = vmatprep.subr.bf16.mxu0 %v3305_v22  ;;  %v3391_v22 = vld [vmem:[#allocation5 + $0x9d0] ss:$8 sps:$4 sm:$0xff]  }
 0x149   :  { %2237 = vmatpush1.bf16.msra.mxu1 %v3300_v23  ;;  %v3396_v23 = vld [vmem:[#allocation5 + $0x4e4] ss:$8 sps:$4 sm:$0xff]  }
 0x14a   :  { %2442 = vmatpush1.bf16.msra.mxu0 %v3303_v24  ;;  %2247 = vmatprep.subr.bf16.mxu1 %v3310_v27  ;;  %v3399_v24 = vld [vmem:[#allocation5 + $0x9e4] ss:$8 sps:$4 sm:$0xff]   ;;  %v3394_v27 = vld [vmem:[#allocation5 + $0x4e0] ss:$8 sps:$4 sm:$0xff]  }
 0x14b   :  { %2452 = vmatprep.subr.bf16.mxu0 %v3315_v28  ;;  %v3397_v28 = vld [vmem:[#allocation5 + $0x9e0] ss:$8 sps:$4 sm:$0xff]  }
 0x14c   :  { %2239 = vmatmul.mubr.bf16.vlgmr.msra.gmra.mrb[0].mxu1 %v2533_v29  ;;  %v3402_v29 = vld [vmem:[#allocation5 + $0x4f4] ss:$8 sps:$4 sm:$0xff]  }
 0x14d   :  { %2444 = vmatmul.mubr.bf16.vlgmr.msra.gmra.mrb[0].mxu0 %v2543_v30  ;;  %2248 = vmatpush1.bf16.msra.mxu1 %v3308_v31  ;;  %v3405_v30 = vld [vmem:[#allocation5 + $0x9f4] ss:$8 sps:$4 sm:$0xff]   ;;  %v3400_v31 = vld [vmem:[#allocation5 + $0x4f0] ss:$8 sps:$4 sm:$0xff]  }
 0x14e   :  { %2453 = vmatpush1.bf16.msra.mxu0 %v3313_v32  ;;  %2249 = vmatprep.subr.bf16.mxu1 %v3318_v33  ;;  %v3403_v32 = vld [vmem:[#allocation5 + $0x9f0] ss:$8 sps:$4 sm:$0xff]   ;;  %v2535_v33 = vcombine.low %v3627_v19, %v3627_v19 }
 0x14f   :  { %2454 = vmatprep.subr.bf16.mxu0 %v3321_v34  ;;  %2279 = vmatprep.mubr.bf16.mxu1 %v2536_v35  ;;  %v2545_v34 = vcombine.low %v3629_v21, %v3629_v21  ;;  %v403_v35 = vlaneseq }
 0x150   :  { %2484 = vmatprep.mubr.bf16.mxu0 %v2546_v25 }
 0x151   :  { %2250 = vmatpush1.bf16.msra.mxu1 %v3316_v26  ;;  %v404_v25 = vshrl.u32 %v403_v35, 7 }
 0x152   :  { %2455 = vmatpush1.bf16.msra.mxu0 %v3319_v36  ;;  %2251 = vmatprep.subr.bf16.mxu1 %v3324_v37  ;;  %v401_v36 = vld [vmem:[#allocation7] sm:$0x3] }
 0x153   :  { %2456 = vmatprep.subr.bf16.mxu0 %v3327_v38  ;;  %v405_v26 = vsub.s32 0, %v404_v25  ;;  %v409_v37 = vsub.s32 1, %v404_v25 }
 0x155   :  { %2252 = vmatpush1.bf16.msra.mxu1 %v3322_v39  ;;  %v406_v38 = vrot.slane %v401_v36, %v405_v26  ;;  %v410_v39 = vrot.slane %v401_v36, %v409_v37 }
 0x156   :  { %2457 = vmatpush1.bf16.msra.mxu0 %v3325_v40  ;;  %2253 = vmatprep.subr.bf16.mxu1 %v3330_v41  ;;  %v2493_v40 = vld [vmem:[#allocation8] sm:$0x3] }
 0x157   :  { %2458 = vmatprep.subr.bf16.mxu0 %v3333_v42 }
 0x159   :  { %2254 = vmatpush1.bf16.msra.mxu1 %v3328_v43 }
 0x15a   :  { %2459 = vmatpush1.bf16.msra.mxu0 %v3331_v44  ;;  %2255 = vmatprep.subr.bf16.mxu1 %v3336_v45  ;;  %v2498_v45 = vrot.slane %v2493_v40, %v405_v26 }
 0x15b   :  { %2460 = vmatprep.subr.bf16.mxu0 %v3339_v46 }
 0x15d   :  { %2256 = vmatpush1.bf16.msra.mxu1 %v3334_v47 }
 0x15e   :  { %2461 = vmatpush1.bf16.msra.mxu0 %v3337_v48  ;;  %2257 = vmatprep.subr.bf16.mxu1 %v3342_v49  ;;  %v2502_v48 = vrot.slane %v2493_v40, %v409_v37 }
 0x15f   :  { %2462 = vmatprep.subr.bf16.mxu0 %v3345_v50 }
 0x161   :  { %2258 = vmatpush1.bf16.msra.mxu1 %v3340_v51 }
 0x162   :  { %2463 = vmatpush1.bf16.msra.mxu0 %v3343_v52  ;;  %2259 = vmatprep.subr.bf16.mxu1 %v3348_v53 }
 0x163   :  { %2464 = vmatprep.subr.bf16.mxu0 %v3351_v54 }
 0x165   :  { %2260 = vmatpush1.bf16.msra.mxu1 %v3346_v55 }
 0x166   :  { %2465 = vmatpush1.bf16.msra.mxu0 %v3349_v56  ;;  %2261 = vmatprep.subr.bf16.mxu1 %v3354_v57  ;;  %v2867_v56 = vld [vmem:[#allocation2] ss:$0 sm:$0xff] }
 0x167   :  { %2466 = vmatprep.subr.bf16.mxu0 %v3357_v58 }
 0x169   :  { %2262 = vmatpush1.bf16.msra.mxu1 %v3352_v59 }
 0x16a   :  { %2467 = vmatpush1.bf16.msra.mxu0 %v3355_v60  ;;  %2263 = vmatprep.subr.bf16.mxu1 %v3360_v61 }
 0x16b   :  { %2468 = vmatprep.subr.bf16.mxu0 %v3363_v62 }
 0x16d   :  { %2264 = vmatpush1.bf16.msra.mxu1 %v3358_v63 }
 0x16e   :  { %2469 = vmatpush1.bf16.msra.mxu0 %v3361_v0  ;;  %2265 = vmatprep.subr.bf16.mxu1 %v3366_v1 }
 0x16f   :  { %2470 = vmatprep.subr.bf16.mxu0 %v3369_v2 }
 0x171   :  { %2266 = vmatpush1.bf16.msra.mxu1 %v3364_v3 }
 0x172   :  { %2471 = vmatpush1.bf16.msra.mxu0 %v3367_v4  ;;  %2267 = vmatprep.subr.bf16.mxu1 %v3372_v5 }
 0x173   :  { %2472 = vmatprep.subr.bf16.mxu0 %v3375_v6 }
 0x175   :  { %2268 = vmatpush1.bf16.msra.mxu1 %v3370_v7 }
 0x176   :  { %2473 = vmatpush1.bf16.msra.mxu0 %v3373_v8  ;;  %2269 = vmatprep.subr.bf16.mxu1 %v3378_v9 }
 0x177   :  { %2474 = vmatprep.subr.bf16.mxu0 %v3381_v10 }
 0x179   :  { %2270 = vmatpush1.bf16.msra.mxu1 %v3376_v11 }
 0x17a   :  { %2475 = vmatpush1.bf16.msra.mxu0 %v3379_v12  ;;  %2271 = vmatprep.subr.bf16.mxu1 %v3384_v13 }
 0x17b   :  { %2476 = vmatprep.subr.bf16.mxu0 %v3387_v14 }
 0x17d   :  { %2272 = vmatpush1.bf16.msra.mxu1 %v3382_v15 }
 0x17e   :  { %2477 = vmatpush1.bf16.msra.mxu0 %v3385_v16  ;;  %2273 = vmatprep.subr.bf16.mxu1 %v3390_v17 }
 0x17f   :  { %2478 = vmatprep.subr.bf16.mxu0 %v3393_v18 }
 0x181   :  { %2274 = vmatpush1.bf16.msra.mxu1 %v3388_v20 }
 0x182   :  { %2479 = vmatpush1.bf16.msra.mxu0 %v3391_v22  ;;  %2275 = vmatprep.subr.bf16.mxu1 %v3396_v23 }
 0x183   :  { %2480 = vmatprep.subr.bf16.mxu0 %v3399_v24 }
 0x185   :  { %2276 = vmatpush1.bf16.msra.mxu1 %v3394_v27 }
 0x186   :  { %2481 = vmatpush1.bf16.msra.mxu0 %v3397_v28  ;;  %2277 = vmatprep.subr.bf16.mxu1 %v3402_v29 }
 0x187   :  { %2482 = vmatprep.subr.bf16.mxu0 %v3405_v30 }
 0x189   :  { %2278 = vmatpush1.bf16.msra.mxu1 %v3400_v31 }
 0x18a   :  { %2483 = vmatpush1.bf16.msra.mxu0 %v3403_v32 }
 0x18c   :  { %2280 = vmatmul.mubr.bf16.vlgmr.msra.gmra.mrb[0].mxu1 %v2535_v33 }
 0x18d   :  { %2485 = vmatmul.mubr.bf16.vlgmr.msra.gmra.mrb[0].mxu0 %v2545_v34 }
 0x25f   :  { %v2281_v41 = vpop.f32.mrb[0].mxu1 }
 0x260   :  { %v2486_v42 = vpop.f32.mrb[0].mxu0  ;;  %v2868_v43 = vadd.f32 %v2281_v41, %v406_v38  ;;  %v2283_v44 = vpop.f32.mrb[1].mxu1 }
 0x261   :  { %v2488_v19 = vpop.f32.mrb[1].mxu0  ;;  %v2870_v46 = vadd.f32 %v2283_v44, %v410_v39  ;;  %v2285_v21 = vpop.f32.mrb[2].mxu1 }
 0x262   :  { %v2490_v47 = vpop.f32.mrb[2].mxu0  ;;  %v2869_v49 = vadd.f32 %v2868_v43, %v2486_v42  ;;  %v2286_v50 = vpop.f32.mrb[3].mxu1 }
 0x263   :  { %v2491_v51 = vpop.f32.mrb[3].mxu0  ;;  %v2871_v52 = vadd.f32 %v2870_v46, %v2488_v19 }
 0x264   :  { %v2505_v53 = vmul.f32 %v2869_v49, %v2498_v45 }
 0x265   :  { %v2506_v54 = vmul.f32 %v2871_v52, %v2502_v48 }
 0x267   :  { %v2507_v55 = vadd.f32 %v2506_v54, %v2505_v53 }
 0x269   :  { %2508 = vadd.xlane.f32.xlu0 %v2507_v55 }
 0x2f6   :  { %v2509_v57 = vpop.xlane.xlu0 %2508 }
 0x2f7   :  { %v2517_v58 = vadd.f32 %v2867_v56, %v2509_v57 }
 0x2f9   :  { %2519 = vst.msk [vmem:[%s3647_s5] sm:$0xff] %vm2518_vm0, %v2517_v58 }
 0x2fa   :  { %2524 = vsyncpa [#allocation4], 1 }
 0x2fb   :  { %2525 = vsyncpa [#allocation6], 1 }
 0x2fc   :  { %2526 = vsyncpa [#allocation9], 1 }

</bundles_post_ra>
